<compile_context>
chip_gen: v7x
topology: tpu7x:2x2x1
jax: 0.10.0
libtpu: 0.0.40
codegen_flags: <defaults>
</compile_context>

<pallas_src>
import functools

import jax
import jax.numpy as jnp
from jax.experimental import pallas as pl
from jax.experimental.pallas import tpu as pltpu


# ----------------------------------------------------------------------------
# Kernel: one batch tile per grid step, batch in lanes, two fused matmuls.
# ----------------------------------------------------------------------------
def _model0_a_kernel(x_ref, w1_ref, b1_ref, w2_ref, b2_ref, out_ref,
                     *, total_b, need_mask):
    x = x_ref[...]                                    # [TB, 2+E]  (raw x_in tile)

    # Stage 1: all four first Linear layers fused into one matmul contracting
    # the feature axis of x (rhs contracted on its minor dim, as in flash);
    # result is lane-major [Hp+Hf, TB].
    h = jax.lax.dot_general(
        w1_ref[...], x,
        dimension_numbers=(((1,), (1,)), ((), ())),
        preferred_element_type=jnp.float32)           # [H1, TB]
    h = jnp.maximum(h + b1_ref[...], 0.0)

    # Stage 2: both second Linear layers fused into one block-diagonal matmul.
    y = jnp.dot(w2_ref[...], h,
                preferred_element_type=jnp.float32) + b2_ref[...]   # [2*(R+F), TB]

    # Merged reduction: rows [0, R+F) = [p_ref; p_ent], rows [R+F, 2(R+F)) =
    # [x_ref; x_ent] -> v_ref + v_entropy, lane-dense.
    half = y.shape[0] // 2
    v = jnp.sum(y[:half, :] * y[half:, :], axis=0, keepdims=True)   # [1, TB]

    if need_mask:  # ragged final tile: zero the out-of-range lanes in-kernel
        tb = v.shape[1]
        lane = jax.lax.broadcasted_iota(jnp.int32, (1, tb), 1)
        valid = pl.program_id(0) * tb + lane < total_b
        v = jnp.where(valid, v, 0.0)

    out_ref[...] = v.astype(out_ref.dtype)


# ----------------------------------------------------------------------------
# Wrapper
# ----------------------------------------------------------------------------
def model0_a_forward(x_in, kparams, *, tile_b=8192):
    """x_in = [temperature(1) | entropy(1) | embedding(E)], returns (B, 1)."""
    w1, b1, w2, b2 = kparams
    B, Din = x_in.shape
    E = w1.shape[1] - 2
    assert Din == 2 + E

    if B <= tile_b:
        # Single full-batch block: full-extent dims satisfy the (8,128) rule.
        tile = B
        num_tiles = 1
    else:
        assert tile_b % 128 == 0, "batch tile must be a multiple of 128 lanes"
        tile = tile_b
        num_tiles = pl.cdiv(B, tile)
    need_mask = (num_tiles * tile != B)

    H1 = w1.shape[0]
    H2 = w2.shape[0]

    # Rough per-step VMEM: x double-buffered (lane-padded to 128), stage-1/2
    # intermediates, output slab + slack.  Capped comfortably under v7x's
    # 64 MiB physical VMEM; floor of 32 MiB covers the v5e 16 MiB scoped default.
    est = tile * 4 * (2 * 128 + H1 + 48 + H2 + 16)
    vmem_limit = int(min(max(32 << 20, 2 * est), 56 << 20))

    n_weight_bytes = 4 * sum(int(p.size) for p in kparams)
    cost = pl.CostEstimate(
        flops=int(2 * B * (Din * H1 + H1 * H2) + 4 * B * H2),
        transcendentals=0,
        bytes_accessed=int(4 * B * (Din + 1) + n_weight_bytes),
    )

    kernel = functools.partial(_model0_a_kernel, total_b=B, need_mask=need_mask)
    const2d = lambda i: (0, 0)          # resident weights: never re-DMA'd

    out = pl.pallas_call(
        kernel,
        out_shape=jax.ShapeDtypeStruct((1, B), jnp.float32),
        grid=(num_tiles,),
        in_specs=[
            pl.BlockSpec((tile, Din), lambda i: (i, 0)),   # streamed x_in tile
            pl.BlockSpec(w1.shape, const2d),
            pl.BlockSpec(b1.shape, const2d),
            pl.BlockSpec(w2.shape, const2d),
            pl.BlockSpec(b2.shape, const2d),
        ],
        out_specs=pl.BlockSpec((1, tile), lambda i: (0, i)),  # lane-dense store
        compiler_params=pltpu.CompilerParams(
            dimension_semantics=("parallel",),   # 2 TCs on v7x
            vmem_limit_bytes=vmem_limit),
        cost_estimate=cost,
    )(x_in, w1, b1, w2, b2)

    return out.reshape(B, 1)


# ----------------------------------------------------------------------------
# Parameter construction (torch-Linear layout) + host-side fusion prep
# ----------------------------------------------------------------------------
def init_torch_params(key, embedding_size, entropy_feature_size,
                      ref_feature_size, hidden):
    """Four 2-layer MLPs, weights in torch layout [out, in], bias [out]."""
    E, F, R = embedding_size, entropy_feature_size, ref_feature_size

    def linear(k, fan_in, fan_out):
        kw, kb = jax.random.split(k)
        bound = 1.0 / jnp.sqrt(fan_in)
        w = jax.random.uniform(kw, (fan_out, fan_in), jnp.float32, -bound, bound)
        b = jax.random.uniform(kb, (fan_out,), jnp.float32, -bound, bound)
        return w, b

    ks = jax.random.split(key, 8)
    wrf1, brf1 = linear(ks[0], 1, hidden)        # ref_feature_net.0
    wrf2, brf2 = linear(ks[1], hidden, R)        # ref_feature_net.2
    wef1, bef1 = linear(ks[2], 1, hidden)        # entropy_feature_net.0
    wef2, bef2 = linear(ks[3], hidden, F)        # entropy_feature_net.2
    wpr1, bpr1 = linear(ks[4], E, hidden)        # ref_parameter_net.0
    wpr2, bpr2 = linear(ks[5], hidden, R)        # ref_parameter_net.2
    wpe1, bpe1 = linear(ks[6], E, hidden)        # parameter_net.0
    wpe2, bpe2 = linear(ks[7], hidden, F)        # parameter_net.2
    return dict(wrf1=wrf1, brf1=brf1, wrf2=wrf2, brf2=brf2,
                wef1=wef1, bef1=bef1, wef2=wef2, bef2=bef2,
                wpr1=wpr1, bpr1=bpr1, wpr2=wpr2, bpr2=bpr2,
                wpe1=wpe1, bpe1=bpe1, wpe2=wpe2, bpe2=bpe2)


def prep_kernel_params(tp):
    """Host-side fusion of the four MLPs into two kernel matmuls (exact math).

    Stage 1 weight acts on raw x_in columns [t | s | embedding]:
      rows 0:Hpr         -> ref_parameter_net.0   (embedding columns)
      rows Hpr:Hpr+Hpe   -> parameter_net.0       (embedding columns)
      next Hrf rows      -> ref_feature_net.0     (t column)
      last Hef rows      -> entropy_feature_net.0 (s column)
    Stage 2 weight is block-diagonal over that stacked hidden, producing
      rows [p_ref(R); p_ent(F); x_ref(R); x_ent(F)].
    """
    E = tp["wpr1"].shape[1]
    Hpr, Hpe = tp["wpr1"].shape[0], tp["wpe1"].shape[0]
    Hrf, Hef = tp["wrf1"].shape[0], tp["wef1"].shape[0]
    R, F = tp["wpr2"].shape[0], tp["wpe2"].shape[0]
    z = lambda r, c: jnp.zeros((r, c), jnp.float32)

    w1 = jnp.concatenate([
        jnp.concatenate([z(Hpr, 1), z(Hpr, 1), tp["wpr1"]], axis=1),
        jnp.concatenate([z(Hpe, 1), z(Hpe, 1), tp["wpe1"]], axis=1),
        jnp.concatenate([tp["wrf1"], z(Hrf, 1), z(Hrf, E)], axis=1),
        jnp.concatenate([z(Hef, 1), tp["wef1"], z(Hef, E)], axis=1),
    ], axis=0)                                                     # [H1, 2+E]
    b1 = jnp.concatenate([tp["bpr1"], tp["bpe1"], tp["brf1"], tp["bef1"]])[:, None]

    H1 = Hpr + Hpe + Hrf + Hef
    w2 = jnp.zeros((2 * (R + F), H1), jnp.float32)
    w2 = w2.at[0:R, 0:Hpr].set(tp["wpr2"])
    w2 = w2.at[R:R + F, Hpr:Hpr + Hpe].set(tp["wpe2"])
    w2 = w2.at[R + F:2 * R + F, Hpr + Hpe:Hpr + Hpe + Hrf].set(tp["wrf2"])
    w2 = w2.at[2 * R + F:, Hpr + Hpe + Hrf:].set(tp["wef2"])
    b2 = jnp.concatenate([tp["bpr2"], tp["bpe2"], tp["brf2"], tp["bef2"]])[:, None]
    return (w1, b1, w2, b2)


# ----------------------------------------------------------------------------
# Pure-JAX reference matching the torch forward exactly
# ----------------------------------------------------------------------------
def reference_forward(x_in, tp):
    t, s, e = x_in[:, 0:1], x_in[:, 1:2], x_in[:, 2:]

    def mlp(z, w1, b1, w2, b2):
        h = jnp.maximum(z @ w1.T + b1, 0.0)
        return h @ w2.T + b2

    x_ref = mlp(t, tp["wrf1"], tp["brf1"], tp["wrf2"], tp["brf2"])
    x_ent = mlp(s, tp["wef1"], tp["bef1"], tp["wef2"], tp["bef2"])
    p_ref = mlp(e, tp["wpr1"], tp["bpr1"], tp["wpr2"], tp["bpr2"])
    p_ent = mlp(e, tp["wpe1"], tp["bpe1"], tp["wpe2"], tp["bpe2"])
    v = jnp.sum(p_ent * x_ent, axis=1) + jnp.sum(p_ref * x_ref, axis=1)
    return v[:, None]


if __name__ == "__main__":
    embedding_size = 32
    entropy_feature_size = 8
    ref_feature_size = 8
    hidden = 32

    key = jax.random.PRNGKey(0)
    k_params, k_x = jax.random.split(key)

    torch_params = init_torch_params(k_params, embedding_size,
                                     entropy_feature_size, ref_feature_size,
                                     hidden)
    kernel_params = prep_kernel_params(torch_params)

    # Case 1: multi-tile grid with a ragged final tile (exercises the
    # in-kernel lane mask and boundary blocks).
    batch1 = 300
    x1 = jax.random.normal(k_x, (batch1, 2 + embedding_size), jnp.float32)
    out1 = jax.block_until_ready(model0_a_forward(x1, kernel_params, tile_b=128))
    ref1 = reference_forward(x1, torch_params)
    assert out1.shape == (batch1, 1)
    assert jnp.allclose(out1, ref1, rtol=1e-4, atol=1e-4), (out1[:4], ref1[:4])

    # Case 2: single full-batch block (the default large-tile path for B <= tile_b).
    batch2 = 200
    x2 = jax.random.normal(jax.random.fold_in(k_x, 1),
                           (batch2, 2 + embedding_size), jnp.float32)
    out2 = jax.block_until_ready(model0_a_forward(x2, kernel_params))
    ref2 = reference_forward(x2, torch_params)
    assert out2.shape == (batch2, 1)
    assert jnp.allclose(out2, ref2, rtol=1e-4, atol=1e-4), (out2[:4], ref2[:4])

    print("KERNEL_OK")
</pallas_src>

<mosaic_0001>
module attributes {stable_mosaic.version = 11 : i64} {
  func.func @_model0_a_kernel(%arg0: i32, %arg1: memref<128x34xf32, #tpu.memory_space<vmem>>, %arg2: memref<128x34xf32, #tpu.memory_space<vmem>>, %arg3: memref<128x1xf32, #tpu.memory_space<vmem>>, %arg4: memref<32x128xf32, #tpu.memory_space<vmem>>, %arg5: memref<32x1xf32, #tpu.memory_space<vmem>>, %arg6: memref<1x128xf32, #tpu.memory_space<vmem>>) attributes {dimension_semantics = [#tpu.dimension_semantics<parallel>], iteration_bounds = array<i64: 3>, scalar_prefetch = 0 : i64, scratch_operands = 0 : i64, tpu.core_type = #tpu.core_type<tc>, window_params = [{transform_indices = @transform_0, window_bounds = array<i64: 128, 34>}, {pipeline_mode = #tpu.pipeline_mode<synchronous>, transform_indices = @transform_1, window_bounds = array<i64: 128, 34>}, {pipeline_mode = #tpu.pipeline_mode<synchronous>, transform_indices = @transform_2, window_bounds = array<i64: 128, 1>}, {pipeline_mode = #tpu.pipeline_mode<synchronous>, transform_indices = @transform_3, window_bounds = array<i64: 32, 128>}, {pipeline_mode = #tpu.pipeline_mode<synchronous>, transform_indices = @transform_4, window_bounds = array<i64: 32, 1>}, {transform_indices = @transform_5, window_bounds = array<i64: 1, 128>}]} {
    %c0 = arith.constant 0 : index
    %c0_0 = arith.constant 0 : index
    %0 = vector.load %arg1[%c0, %c0_0] : memref<128x34xf32, #tpu.memory_space<vmem>>, vector<128x34xf32>
    %c0_1 = arith.constant 0 : index
    %c0_2 = arith.constant 0 : index
    %1 = vector.load %arg2[%c0_1, %c0_2] : memref<128x34xf32, #tpu.memory_space<vmem>>, vector<128x34xf32>
    %cst = arith.constant dense<0.000000e+00> : vector<128x128xf32>
    %2 = tpu.matmul %1, %0, %cst {dimension_numbers = #tpu.dot_dimension_numbers<[1], [1], [0], [0], [0, 0, 1, 0], [], []>} : vector<128x34xf32>, vector<128x34xf32>, vector<128x128xf32> -> vector<128x128xf32>
    %c0_3 = arith.constant 0 : index
    %c0_4 = arith.constant 0 : index
    %3 = vector.load %arg3[%c0_3, %c0_4] : memref<128x1xf32, #tpu.memory_space<vmem>>, vector<128x1xf32>
    %4 = vector.broadcast %3 : vector<128x1xf32> to vector<128x128xf32>
    %5 = arith.addf %2, %4 : vector<128x128xf32>
    %cst_5 = arith.constant 0.000000e+00 : f32
    %6 = vector.broadcast %cst_5 : f32 to vector<128x128xf32>
    %7 = arith.maximumf %5, %6 : vector<128x128xf32>
    %c0_6 = arith.constant 0 : index
    %c0_7 = arith.constant 0 : index
    %8 = vector.load %arg4[%c0_6, %c0_7] : memref<32x128xf32, #tpu.memory_space<vmem>>, vector<32x128xf32>
    %cst_8 = arith.constant dense<0.000000e+00> : vector<32x128xf32>
    %9 = tpu.matmul %8, %7, %cst_8 {dimension_numbers = #tpu.dot_dimension_numbers<[1], [0], [0], [1], [0, 0, 1, 1], [], []>} : vector<32x128xf32>, vector<128x128xf32>, vector<32x128xf32> -> vector<32x128xf32>
    %c0_9 = arith.constant 0 : index
    %c0_10 = arith.constant 0 : index
    %10 = vector.load %arg5[%c0_9, %c0_10] : memref<32x1xf32, #tpu.memory_space<vmem>>, vector<32x1xf32>
    %11 = vector.broadcast %10 : vector<32x1xf32> to vector<32x128xf32>
    %12 = arith.addf %9, %11 : vector<32x128xf32>
    %13 = vector.extract_strided_slice %12 {offsets = [0, 0], sizes = [16, 128], strides = [1, 1]} : vector<32x128xf32> to vector<16x128xf32>
    %14 = vector.extract_strided_slice %12 {offsets = [16, 0], sizes = [16, 128], strides = [1, 1]} : vector<32x128xf32> to vector<16x128xf32>
    %15 = arith.mulf %13, %14 : vector<16x128xf32>
    %cst_11 = arith.constant dense<0.000000e+00> : vector<128xf32>
    %16 = vector.multi_reduction <add>, %15, %cst_11 [0] : vector<16x128xf32> to vector<128xf32>
    %17 = vector.shape_cast %16 : vector<128xf32> to vector<1x128xf32>
    %18 = tpu.iota {dimensions = array<i32: 1>} : vector<1x128xi32>
    %c128_i32 = arith.constant 128 : i32
    %19 = arith.muli %arg0, %c128_i32 : i32
    %20 = vector.broadcast %19 : i32 to vector<1x128xi32>
    %21 = arith.addi %20, %18 : vector<1x128xi32>
    %c300_i32 = arith.constant 300 : i32
    %22 = vector.broadcast %c300_i32 : i32 to vector<1x128xi32>
    %23 = arith.cmpi slt, %21, %22 : vector<1x128xi32>
    %cst_12 = arith.constant 0.000000e+00 : f32
    %24 = vector.broadcast %cst_12 : f32 to vector<1x128xf32>
    %25 = arith.select %23, %17, %24 : vector<1x128xi1>, vector<1x128xf32>
    %c0_13 = arith.constant 0 : index
    %c0_14 = arith.constant 0 : index
    %26 = vector.load %arg6[%c0_13, %c0_14] : memref<1x128xf32, #tpu.memory_space<vmem>>, vector<1x128xf32>
    tpu.vector_store %arg6[%c0_13, %c0_14], %25 {strides = array<i32>} : memref<1x128xf32, #tpu.memory_space<vmem>>, vector<1x128xf32>,
    return
  }
  func.func @transform_0(%arg0: i32) -> (i32, i32) {
    %c0_i32 = arith.constant 0 : i32
    %c0_i32_0 = arith.constant 0 : i32
    return %arg0, %c0_i32 : i32, i32
  }
  func.func @transform_1(%arg0: i32) -> (i32, i32) {
    %c0_i32 = arith.constant 0 : i32
    %c0_i32_0 = arith.constant 0 : i32
    %c0_i32_1 = arith.constant 0 : i32
    return %c0_i32, %c0_i32_0 : i32, i32
  }
  func.func @transform_2(%arg0: i32) -> (i32, i32) {
    %c0_i32 = arith.constant 0 : i32
    %c0_i32_0 = arith.constant 0 : i32
    %c0_i32_1 = arith.constant 0 : i32
    return %c0_i32, %c0_i32_0 : i32, i32
  }
  func.func @transform_3(%arg0: i32) -> (i32, i32) {
    %c0_i32 = arith.constant 0 : i32
    %c0_i32_0 = arith.constant 0 : i32
    %c0_i32_1 = arith.constant 0 : i32
    return %c0_i32, %c0_i32_0 : i32, i32
  }
  func.func @transform_4(%arg0: i32) -> (i32, i32) {
    %c0_i32 = arith.constant 0 : i32
    %c0_i32_0 = arith.constant 0 : i32
    %c0_i32_1 = arith.constant 0 : i32
    return %c0_i32, %c0_i32_0 : i32, i32
  }
  func.func @transform_5(%arg0: i32) -> (i32, i32) {
    %c0_i32 = arith.constant 0 : i32
    %c0_i32_0 = arith.constant 0 : i32
    return %c0_i32, %arg0 : i32, i32
  }
}

</mosaic_0001>

<bundles_post_ra>
// kernel: tpu_custom_call.1
= control target key start
LH: loop header
LB: loop body
LE: loop exit
PB: predicated region body
PF: predicated region fallthrough
CT: control target
= control target key end

     0   :  { %10 = vsyncpa [#allocation3], 0  ;;  %s1530_s0 = inlined_call_operand.vmem [shape: f32[300,34], index: 0, kind: input, shape index: {}]   ;;  %s1531_s1 = inlined_call_operand.vmem [shape: f32[128,34], index: 1, kind: input, shape index: {}]   ;;  %s1532_s2 = inlined_call_operand.vmem [shape: f32[128,1], index: 2, kind: input, shape index: {}]   ;;  %s1533_s3 = inlined_call_operand.vmem [shape: f32[32,128], index: 3, kind: input, shape index: {}]   ;;  %s1534_s4 = inlined_call_operand.vmem [shape: f32[32,1], index: 4, kind: input, shape index: {}]   ;;  %s1535_s5 = inlined_call_operand.hbm [shape: f32[1,300], index: 5, kind: output, shape index: {}]  }
   0x1   :  { %12 = vsyncpa [#allocation3 + $0x1], 0  ;;  %s1234_s18 = smov 0   ;;  %s1236_s19 = smov 0  }
   0x2   :  { %s1238_s20 = smov 0   ;;  %s1240_s21 = smov 0  }
   0x3 LB: > { %s1255_s22 = sadd.s32 4294967295, %s1200_s21   ;;  %s828_s23 = sadd.s32 4294967294, %s1200_s21   ;;  %s1200_s21 = sphi %s1240_s21, %s1543_s21   ;;  %s1196_s20 = sphi %s1238_s20, %s1542_s20   ;;  %s1192_s19 = sphi %s1236_s19, %s1541_s19   ;;  %s1188_s18 = sphi %s1234_s18, %s1540_s18  }
   0x4   : > { %s1259_s24 = sadd.s32 1, %s1200_s21   ;;  %s135_s25 = sadd.s32 1, %s1196_s20 }
   0x5   : > { %s132_s26 = ssub.s32 %s1200_s21, %s1259_s24  ;;  %p145_p0 = scmp.ne.s32.totalorder %s1196_s20, %s1192_s19 }
   0x6   : > { %p133_p1 = scmp.eq.s32.totalorder %s132_s26, 0  ;;  %p146_p2 = scmp.eq.s32.totalorder %s1255_s22, 2 }
   0x7   : > { %p151_p3 = scmp.ne.s32.totalorder %s1192_s19, %s1188_s18  ;;  %p152_p4 = scmp.eq.s32.totalorder %s828_s23, 2 }
   0x8   : > { %s1270_s27 = scalar_select %p133_p1, %s1196_s20, %s135_s25  }
   0x9   : > { %p1272_p5 = por %p146_p2, %p145_p0  ;;  %p1276_p6 = por %p152_p4, %p151_p3 }
   0xa   : > { %p831_p7 = scmp.ge.s32.totalorder %s1200_s21, 1  ;;  %p199_p8 = scmp.lt.s32.totalorder %s1200_s21, 4 }
   0xc   : > { %p200_p9 = pnand %p831_p7, %p199_p8 }
   0xd   : > { %s1283_s30 = sshll.u32 (!%p200_p9), %s1255_s22, 4  ;;  %vm372_vm0 = vcmask (!%p200_p9), 277504   ;;  %v260_v0 = vld [vmem:[%s1531_s1] sm:$0xff] (!%p200_p9)  ;;  %v1202_v1 = vmov (!%p200_p9), 0   ;;  %v278_v4 = vld [vmem:[%s1532_s2 + $0x10] sm:$0xff] (!%p200_p9)  ;;  %v277_v5 = vld [vmem:[%s1532_s2 + $0x8] sm:$0xff] (!%p200_p9) }
   0xe   : > { %203 = sbr.rel (%p200_p9) target bundleno = 593 (0x251), region = 40  ;;  %p235_p10 = scmp.lt.s32.totalorder (!%p200_p9), %s1283_s30, 37  ;;  %954 = vmatprep.mubr.msk.f32.mxu0 (!%p200_p9), %vm372_vm0, %v260_v0  ;;  %1136 = vset.pattern.permute.xlu0 (!%p200_p9), %v1202_v1  ;;  %v276_v2 = vld [vmem:[%s1532_s2] sm:$0xff] (!%p200_p9)  ;;  %vm1301_vm1 = vmpackc.low (!%p200_p9), %vm372_vm0, %vm372_vm0  ;;  %v279_v11 = vld [vmem:[%s1532_s2 + $0x18] sm:$0xff] (!%p200_p9) }
   0xf   : > { %1137 = vset.pattern.permute.xlu1 (!%p200_p9), %v1202_v1  ;;  %294 = vperm.xlu0 (!%p200_p9), %1136, %v276_v2   ;;  %v280_v13 = vld [vmem:[%s1532_s2 + $0x20] sm:$0xff] (!%p200_p9)  ;;  %v281_v14 = vld [vmem:[%s1532_s2 + $0x28] sm:$0xff] (!%p200_p9)  ;;  %v282_v17 = vld [vmem:[%s1532_s2 + $0x30] sm:$0xff] (!%p200_p9)  ;;  %s866_s23 = sshll.u32 (!%p200_p9), %s1255_s22, 7  ;;  %s228_s25 = sand.u32 (!%p200_p9), 1, %s1192_s19  }
  0x10   : > { %304 = vperm.xlu1 (!%p200_p9), %1137, %v278_v4   ;;  %v283_v19 = vld [vmem:[%s1532_s2 + $0x38] sm:$0xff] (!%p200_p9)  ;;  %v284_v20 = vld [vmem:[%s1532_s2 + $0x40] sm:$0xff] (!%p200_p9)  ;;  %v285_v21 = vld [vmem:[%s1532_s2 + $0x48] sm:$0xff] (!%p200_p9)  ;;  %s229_s26 = scalar_lea.vmem (!%p200_p9), [#allocation2], %s228_s25  ;;  %s761_s22 = scalar_lea.sflag (!%p200_p9), [#allocation3], %s228_s25 }
  0x11   : > { %v286_v24 = vld [vmem:[%s1532_s2 + $0x50] sm:$0xff] (!%p200_p9)  ;;  %v287_v26 = vld [vmem:[%s1532_s2 + $0x58] sm:$0xff] (!%p200_p9)  ;;  %v288_v27 = vld [vmem:[%s1532_s2 + $0x60] sm:$0xff] (!%p200_p9)  ;;  %s773_s6 = sshll.u32 (!%p200_p9), %s229_s26, 4  ;;  %s1203_s11 = smov (!%p200_p9), [#allocation2]   ;;  %s1490_s6 = int_to_ptr.vmem [resolvable:$true] %s773_s6 }
  0x12   : > { %v289_v28 = vld [vmem:[%s1532_s2 + $0x68] sm:$0xff] (!%p200_p9)  ;;  %v290_v31 = vld [vmem:[%s1532_s2 + $0x70] sm:$0xff] (!%p200_p9)  ;;  %v291_v33 = vld [vmem:[%s1532_s2 + $0x78] sm:$0xff] (!%p200_p9)  ;;  %s1138_s10 = scalar_lea.vmem (!%p200_p9), %s1490_s6, 16  ;;  %s1142_s12 = sshll.u32 (!%p200_p9), %s1203_s11, 4  ;;  %s1143_s12 = int_to_ptr.vmem [resolvable:$false] %s1142_s12 }
  0x13   : > { %299 = vperm.xlu0 (!%p200_p9), %1136, %v277_v5   ;;  %v634_v34 = vld [vmem:[%s1534_s4] sm:$0xff] (!%p200_p9)  ;;  %v635_v35 = vld [vmem:[%s1534_s4 + $0x8] sm:$0xff] (!%p200_p9)  ;;  %v636_v38 = vld [vmem:[%s1534_s4 + $0x10] sm:$0xff] (!%p200_p9)  ;;  %p1139_p11 = scmp.ne.s32.totalorder (!%p200_p9), %s1490_s6, %s1138_s10  ;;  %s1144_s13 = scalar_lea.vmem (!%p200_p9), %s1143_s12, 32 }
  0x14   : > { %309 = vperm.xlu1 (!%p200_p9), %1137, %v279_v11   ;;  %v637_v40 = vld [vmem:[%s1534_s4 + $0x18] sm:$0xff] (!%p200_p9)  ;;  %v261_v47 = vld [vmem:[%s1531_s1 + $0x8] sm:$0xff] (!%p200_p9)  ;;  %v262_v48 = vld [vmem:[%s1531_s1 + $0x10] sm:$0xff] (!%p200_p9)  ;;  %p1145_p0 = scmp.lt.s32.totalorder (!%p200_p9), %s1490_s6, %s1143_s12  ;;  %p1146_p1 = scmp.lt.s32.totalorder (!%p200_p9), %s1144_s13, %s1138_s10 }
  0x15   : > { %s236_s8 = scalar_select %p235_p10, %s1283_s30, 37  ;;  %v263_v49 = vld [vmem:[%s1531_s1 + $0x18] sm:$0xff]  ;;  %v264_v50 = vld [vmem:[%s1531_s1 + $0x20] sm:$0xff]  ;;  %v265_v51 = vld [vmem:[%s1531_s1 + $0x28] sm:$0xff] }
  0x16   : > { %v266_v52 = vld [vmem:[%s1531_s1 + $0x30] sm:$0xff]  ;;  %v267_v53 = vld [vmem:[%s1531_s1 + $0x38] sm:$0xff]  ;;  %v268_v54 = vld [vmem:[%s1531_s1 + $0x40] sm:$0xff]  ;;  %p1140_p12 = pnand %p1139_p11, %p1272_p5  ;;  %p1147_p2 = por %p1146_p1, %p1145_p0 }
  0x17   : > { %s833_s9 = sshll.u32 %s236_s8, 3  ;;  %314 = vperm.xlu0 %1136, %v280_v13   ;;  %v269_v55 = vld [vmem:[%s1531_s1 + $0x48] sm:$0xff]  ;;  %v270_v56 = vld [vmem:[%s1531_s1 + $0x50] sm:$0xff]  ;;  %v271_v57 = vld [vmem:[%s1531_s1 + $0x58] sm:$0xff] }
  0x18   : > { %s1297_s14 = scalar_lea.vmem %s1530_s0, %s833_s9  ;;  %319 = vperm.xlu1 %1137, %v281_v14   ;;  %v272_v58 = vld [vmem:[%s1531_s1 + $0x60] sm:$0xff]  ;;  %v273_v59 = vld [vmem:[%s1531_s1 + $0x68] sm:$0xff]  ;;  %v274_v60 = vld [vmem:[%s1531_s1 + $0x70] sm:$0xff]  ;;  %s1488_s9 = scalar_lea.hbm %s1535_s5, %s1283_s30 }
  0x19   : > { %v244_v6 = vld [vmem:[%s1297_s14] sm:$0xff]  ;;  %v245_v7 = vld [vmem:[%s1297_s14 + $0x8] sm:$0xff]  ;;  %v246_v8 = vld [vmem:[%s1297_s14 + $0x10] sm:$0xff]  ;;  %p1141_p13 = pneg %p1140_p12 }
  0x1a   : > { %v1016_v9 = vpack.c.bf16 %v245_v7, %v244_v6  ;;  %v247_v10 = vld [vmem:[%s1297_s14 + $0x18] sm:$0xff]  ;;  %v248_v15 = vld [vmem:[%s1297_s14 + $0x20] sm:$0xff]  ;;  %v249_v16 = vld [vmem:[%s1297_s14 + $0x28] sm:$0xff] }
  0x1b   : > { %v1022_v12 = vpack.c.bf16 %v247_v10, %v246_v8  ;;  %v1028_v18 = vpack.c.bf16 %v249_v16, %v248_v15  ;;  %324 = vperm.xlu0 %1136, %v282_v17   ;;  %v250_v22 = vld [vmem:[%s1297_s14 + $0x30] sm:$0xff]  ;;  %v251_v23 = vld [vmem:[%s1297_s14 + $0x38] sm:$0xff]  ;;  %v252_v29 = vld [vmem:[%s1297_s14 + $0x40] sm:$0xff]  ;;  %p1148_p3 = pnand %p1147_p2, %p1141_p13 }
  0x1c   : > { %1018 = vmatprep.subr.msk.bf16.mxu0 %vm1301_vm1, %v1016_v9  ;;  %329 = vperm.xlu1 %1137, %v283_v19   ;;  %v1034_v25 = vpack.c.bf16 %v251_v23, %v250_v22  ;;  %v253_v30 = vld [vmem:[%s1297_s14 + $0x48] sm:$0xff]  ;;  %v254_v36 = vld [vmem:[%s1297_s14 + $0x50] sm:$0xff]  ;;  %v255_v37 = vld [vmem:[%s1297_s14 + $0x58] sm:$0xff] }
  0x1d   : > { %1021 = vmatpush3.bf16.xpose.msk.msra.mxu0 %vm1301_vm1, %v1016_v9  ;;  %v1040_v32 = vpack.c.bf16 %v253_v30, %v252_v29  ;;  %v1046_v39 = vpack.c.bf16 %v255_v37, %v254_v36  ;;  %v256_v41 = vld [vmem:[%s1297_s14 + $0x60] sm:$0xff]  ;;  %v257_v42 = vld [vmem:[%s1297_s14 + $0x68] sm:$0xff]  ;;  %v258_v44 = vld [vmem:[%s1297_s14 + $0x70] sm:$0xff] }
  0x1e   : > { %1024 = vmatprep.subr.msk.bf16.mxu0 %vm1301_vm1, %v1022_v12  ;;  %v1052_v43 = vpack.c.bf16 %v257_v42, %v256_v41  ;;  %v259_v45 = vld [vmem:[%s1297_s14 + $0x78] sm:$0xff]  ;;  %v630_v62 = vld [vmem:[%s1533_s3] sm:$0xff] }
  0x1f   : > { %334 = vperm.xlu0 %1136, %v284_v20   ;;  %v1058_v46 = vpack.c.bf16 %v259_v45, %v258_v44  ;;  %v275_v61 = vld [vmem:[%s1531_s1 + $0x78] sm:$0xff]  ;;  %1010 = vmatprep.mubr.f32.mxu1 %v630_v62 }
  0x20   : > { %339 = vperm.xlu1 %1137, %v285_v21  }
  0x23   : > { %344 = vperm.xlu0 %1136, %v286_v24  }
  0x24   : > { %349 = vperm.xlu1 %1137, %v287_v26  }
  0x25   : > { %1027 = vmatpush3.bf16.xpose.msk.msra.mxu0 %vm1301_vm1, %v1022_v12 }
  0x26   : > { %1030 = vmatprep.subr.msk.bf16.mxu0 %vm1301_vm1, %v1028_v18 }
  0x27   : > { %354 = vperm.xlu0 %1136, %v288_v27  }
  0x28   : > { %359 = vperm.xlu1 %1137, %v289_v28  }
  0x2b   : > { %364 = vperm.xlu0 %1136, %v290_v31  }
  0x2c   : > { %369 = vperm.xlu1 %1137, %v291_v33  }
  0x2d   : > { %1033 = vmatpush3.bf16.xpose.msk.msra.mxu0 %vm1301_vm1, %v1028_v18 }
  0x2e   : > { %1036 = vmatprep.subr.msk.bf16.mxu0 %vm1301_vm1, %v1034_v25 }
  0x2f   : > { %640 = vperm.xlu0 %1136, %v634_v34  }
  0x30   : > { %645 = vperm.xlu1 %1137, %v635_v35  }
  0x33   : > { %650 = vperm.xlu0 %1136, %v636_v38  }
  0x34   : > { %655 = vperm.xlu1 %1137, %v637_v40  }
  0x35   : > { %1039 = vmatpush3.bf16.xpose.msk.msra.mxu0 %vm1301_vm1, %v1034_v25 }
  0x36   : > { %1042 = vmatprep.subr.msk.bf16.mxu0 %vm1301_vm1, %v1040_v32 }
  0x3d   : > { %1045 = vmatpush3.bf16.xpose.msk.msra.mxu0 %vm1301_vm1, %v1040_v32 }
  0x3e   : > { %1048 = vmatprep.subr.msk.bf16.mxu0 %vm1301_vm1, %v1046_v39 }
  0x45   : > { %1051 = vmatpush3.bf16.xpose.msk.msra.mxu0 %vm1301_vm1, %v1046_v39 }
  0x46   : > { %1054 = vmatprep.subr.msk.bf16.mxu0 %vm1301_vm1, %v1052_v43 }
  0x4d   : > { %1057 = vmatpush3.bf16.xpose.msk.msra.mxu0 %vm1301_vm1, %v1052_v43 }
  0x4e   : > { %1060 = vmatprep.subr.msk.bf16.mxu0 %vm1301_vm1, %v1058_v46 }
  0x55   : > { %1063 = vmatpush3.bf16.xpose.msk.msra.mxu0 %vm1301_vm1, %v1058_v46 }
  0x5c   : > { %955 = vmatmul.mubr.msk.f32.vlgmr.msra.gmra.mrb[0].mxu0 %vm372_vm0, %v261_v47 }
  0x5d   : > { %957 = vmatprep.mubr.msk.f32.mxu0 %vm372_vm0, %v262_v48 }
  0x60   : > { %958 = vmatmul.mubr.msk.f32.gmra.mrb[2].mxu0 %vm372_vm0, %v263_v49 }
  0x61   : > { %960 = vmatprep.mubr.msk.f32.mxu0 %vm372_vm0, %v264_v50 }
  0x64   : > { %961 = vmatmul.mubr.msk.f32.gmra.mrb[4].mxu0 %vm372_vm0, %v265_v51 }
  0x65   : > { %963 = vmatprep.mubr.msk.f32.mxu0 %vm372_vm0, %v266_v52 }
  0x68   : > { %964 = vmatmul.mubr.msk.f32.gmra.mrb[6].mxu0 %vm372_vm0, %v267_v53 }
  0x69   : > { %966 = vmatprep.mubr.msk.f32.mxu0 %vm372_vm0, %v268_v54 }
  0x6c   : > { %967 = vmatmul.mubr.msk.f32.gmra.mrb[8].mxu0 %vm372_vm0, %v269_v55 }
  0x6d   : > { %969 = vmatprep.mubr.msk.f32.mxu0 %vm372_vm0, %v270_v56 }
  0x70   : > { %970 = vmatmul.mubr.msk.f32.gmra.mrb[10].mxu0 %vm372_vm0, %v271_v57 }
  0x71   : > { %972 = vmatprep.mubr.msk.f32.mxu0 %vm372_vm0, %v272_v58 }
  0x74   : > { %973 = vmatmul.mubr.msk.f32.gmra.mrb[12].mxu0 %vm372_vm0, %v273_v59 }
  0x75   : > { %975 = vmatprep.mubr.msk.f32.mxu0 %vm372_vm0, %v274_v60 }
  0x78   : > { %976 = vmatmul.mubr.msk.f32.gmra.mrb[14].mxu0 %vm372_vm0, %v275_v61 }
  0x8e   : > { %v295_v0 = vpop.permute.xlu0 %294 }
  0x8f   : > { %v305_v63 = vpop.permute.xlu1 %304 }
  0x92   : > { %v300_v2 = vpop.permute.xlu0 %299 }
  0x93   : > { %v310_v1 = vpop.permute.xlu1 %309 }
  0x96   : > { %v315_v4 = vpop.permute.xlu0 %314 }
  0x97   : > { %v320_v3 = vpop.permute.xlu1 %319 }
  0x9a   : > { %v325_v13 = vpop.permute.xlu0 %324 }
  0x9b   : > { %v330_v10 = vpop.permute.xlu1 %329 }
  0x9e   : > { %v335_v26 = vpop.permute.xlu0 %334 }
  0x9f   : > { %v340_v23 = vpop.permute.xlu1 %339 }
  0xa2   : > { %v345_v38 = vpop.permute.xlu0 %344 }
  0xa3   : > { %v350_v35 = vpop.permute.xlu1 %349 }
  0xa6   : > { %v355_v51 = vpop.permute.xlu0 %354 }
  0xa7   : > { %v360_v48 = vpop.permute.xlu1 %359 }
  0xab   : > { %v370_v60 = vpop.permute.xlu1 %369 }
 0x12f   : > { %v956_v5 = vpop.f32.mrb[0].mxu0 }
 0x130   : > { %v541_v6 = vadd.f32 %v956_v5, %v300_v2  ;;  %v535_v7 = vpop.f32.mrb[1].mxu0 }
 0x131   : > { %v536_v8 = vadd.f32 %v535_v7, %v295_v0  ;;  %v631_v7 = vld [vmem:[%s1533_s3 + $0x8] sm:$0xff] }
 0x132   : > { %v615_v9 = vmax.f32 %v541_v6, 0.0 }
 0x133   : > { %v614_v11 = vmax.f32 %v536_v8, 0.0  ;;  %v959_v12 = vpop.f32.mrb[2].mxu0  ;;  %v632_v8 = vld [vmem:[%s1533_s3 + $0x10] sm:$0xff] }
 0x134   : > { %v551_v14 = vadd.f32 %v959_v12, %v310_v1  ;;  %v545_v15 = vpop.f32.mrb[3].mxu0 }
 0x135   : > { %v546_v16 = vadd.f32 %v545_v15, %v305_v63  ;;  %v1064_v17 = vpack.c.bf16 %v615_v9, %v614_v11  ;;  %v365_v63 = vpop.permute.xlu0 %364  ;;  %v633_v9 = vld [vmem:[%s1533_s3 + $0x18] sm:$0xff] }
 0x136   : > { %v617_v18 = vmax.f32 %v551_v14, 0.0 }
 0x137   : > { %v616_v19 = vmax.f32 %v546_v16, 0.0  ;;  %v962_v20 = vpop.f32.mrb[4].mxu0  ;;  %1065 = vmatprep.subr.bf16.mxu1 %v1064_v17 }
 0x138   : > { %v561_v21 = vadd.f32 %v962_v20, %v320_v3  ;;  %v555_v22 = vpop.f32.mrb[5].mxu0  ;;  %1067 = vmatpush3.bf16.msra.mxu1 %v1064_v17 }
 0x139   : > { %v1068_v24 = vpack.c.bf16 %v617_v18, %v616_v19  ;;  %v556_v25 = vadd.f32 %v555_v22, %v315_v4  ;;  %v641_v11 = vpop.permute.xlu0 %640 }
 0x13a   : > { %v619_v27 = vmax.f32 %v561_v21, 0.0 }
 0x13b   : > { %v618_v28 = vmax.f32 %v556_v25, 0.0  ;;  %v965_v29 = vpop.f32.mrb[6].mxu0  ;;  %1069 = vmatprep.subr.bf16.mxu1 %v1068_v24 }
 0x13c   : > { %v571_v30 = vadd.f32 %v965_v29, %v330_v10  ;;  %v565_v31 = vpop.f32.mrb[7].mxu0  ;;  %1071 = vmatpush3.bf16.msra.mxu1 %v1068_v24  ;;  %v646_v10 = vpop.permute.xlu1 %645  ;;  %v752_v24 = vlaneseq  ;;  %v755_v29 = vstv %s866_s23 }
 0x13d   : > { %v1072_v32 = vpack.c.bf16 %v619_v27, %v618_v28  ;;  %v566_v33 = vadd.f32 %v565_v31, %v325_v13  ;;  %v651_v16 = vpop.permute.xlu0 %650 }
 0x13e   : > { %v621_v34 = vmax.f32 %v571_v30, 0.0  ;;  %v753_v27 = vand.u32 127, %v752_v24 }
 0x13f   : > { %v620_v36 = vmax.f32 %v566_v33, 0.0  ;;  %v968_v37 = vpop.f32.mrb[8].mxu0  ;;  %1073 = vmatprep.subr.bf16.mxu1 %v1072_v32 }
 0x140   : > { %v581_v39 = vadd.f32 %v968_v37, %v340_v23  ;;  %v575_v40 = vpop.f32.mrb[9].mxu0  ;;  %1075 = vmatpush3.bf16.msra.mxu1 %v1072_v32  ;;  %v656_v14 = vpop.permute.xlu1 %655  ;;  %v756_v31 = vadd.s32 %v755_v29, %v753_v27 }
 0x141   : > { %v1076_v41 = vpack.c.bf16 %v621_v34, %v620_v36  ;;  %v576_v42 = vadd.f32 %v575_v40, %v335_v26 }
 0x142   : > { %v623_v43 = vmax.f32 %v581_v39, 0.0  ;;  %vm757_vm2 = vcmp.lt.s32.totalorder %v756_v31, 300 }
 0x143   : > { %v622_v44 = vmax.f32 %v576_v42, 0.0  ;;  %v971_v45 = vpop.f32.mrb[10].mxu0  ;;  %1077 = vmatprep.subr.bf16.mxu1 %v1076_v41 }
 0x144   : > { %v591_v46 = vadd.f32 %v971_v45, %v350_v35  ;;  %v585_v47 = vpop.f32.mrb[11].mxu0  ;;  %1079 = vmatpush3.bf16.msra.mxu1 %v1076_v41 }
 0x145   : > { %v1080_v49 = vpack.c.bf16 %v623_v43, %v622_v44  ;;  %v586_v50 = vadd.f32 %v585_v47, %v345_v38 }
 0x146   : > { %v625_v52 = vmax.f32 %v591_v46, 0.0 }
 0x147   : > { %v624_v53 = vmax.f32 %v586_v50, 0.0  ;;  %v974_v54 = vpop.f32.mrb[12].mxu0  ;;  %1081 = vmatprep.subr.bf16.mxu1 %v1080_v49 }
 0x148   : > { %v601_v55 = vadd.f32 %v974_v54, %v360_v48  ;;  %v595_v56 = vpop.f32.mrb[13].mxu0  ;;  %1083 = vmatpush3.bf16.msra.mxu1 %v1080_v49 }
 0x149   : > { %v1084_v57 = vpack.c.bf16 %v625_v52, %v624_v53  ;;  %v596_v58 = vadd.f32 %v595_v56, %v355_v51 }
 0x14a   : > { %v627_v59 = vmax.f32 %v601_v55, 0.0 }
 0x14b   : > { %v626_v61 = vmax.f32 %v596_v58, 0.0  ;;  %v977_v62 = vpop.f32.mrb[14].mxu0  ;;  %1085 = vmatprep.subr.bf16.mxu1 %v1084_v57 }
 0x14c   : > { %v611_v0 = vadd.f32 %v977_v62, %v370_v60  ;;  %v605_v1 = vpop.f32.mrb[15].mxu0  ;;  %1087 = vmatpush3.bf16.msra.mxu1 %v1084_v57 }
 0x14d   : > { %v1088_v2 = vpack.c.bf16 %v627_v59, %v626_v61  ;;  %v606_v3 = vadd.f32 %v605_v1, %v365_v63 }
 0x14e   : > { %v629_v4 = vmax.f32 %v611_v0, 0.0 }
 0x14f   : > { %v628_v5 = vmax.f32 %v606_v3, 0.0  ;;  %1089 = vmatprep.subr.bf16.mxu1 %v1088_v2 }
 0x150   : > { %1091 = vmatpush3.bf16.msra.mxu1 %v1088_v2 }
 0x151   : > { %v1092_v6 = vpack.c.bf16 %v629_v4, %v628_v5 }
 0x153   : > { %1093 = vmatprep.subr.bf16.mxu1 %v1092_v6 }
 0x154   : > { %1095 = vmatpush3.bf16.msra.mxu1 %v1092_v6 }
 0x157   : > { %1011 = vmatmul.mubr.f32.vlgmr.msra.gmra.mrb[0].mxu1 %v631_v7 }
 0x158   : > { %1013 = vmatprep.mubr.f32.mxu1 %v632_v8 }
 0x15b   : > { %1014 = vmatmul.mubr.f32.gmra.mrb[2].mxu1 %v633_v9 }
 0x22a   : > { %v1012_v12 = vpop.f32.mrb[0].mxu1 }
 0x22b   : > { %v724_v13 = vpop.f32.mrb[1].mxu1  ;;  %v730_v17 = vadd.f32 %v1012_v12, %v646_v10 }
 0x22c   : > { %v725_v20 = vadd.f32 %v724_v13, %v641_v11 }
 0x22e   : > { %v1015_v15 = vpop.f32.mrb[2].mxu1 }
 0x22f   : > { %v740_v18 = vadd.f32 %v1015_v15, %v656_v14  ;;  %v734_v19 = vpop.f32.mrb[3].mxu1 }
 0x230   : > { %v735_v21 = vadd.f32 %v734_v19, %v651_v16 }
 0x231   : > { %v744_v22 = vmul.f32 %v740_v18, %v730_v17 }
 0x232   : > { %v743_v23 = vmul.f32 %v735_v21, %v725_v20 }
 0x234   : > { %v745_v25 = vadd.f32 %v744_v22, %v743_v23 }
 0x236   : > { %v746_v26 = vrot.slane %v745_v25, 4 }
 0x238   : > { %v747_v28 = vadd.f32 %v746_v26, %v745_v25 }
 0x23a   : > { %v748_v30 = vrot.slane %v747_v28, 2 }
 0x23c   : > { %v749_v32 = vadd.f32 %v748_v30, %v747_v28 }
 0x23e   : > { %v750_v33 = vrot.slane %v749_v32, 1 }
 0x240   : > { %v751_v34 = vadd.f32 %v750_v33, %v749_v32 }
 0x242   : > { %v758_v35 = vsel %vm757_vm2, %v751_v34, 0.0 }
 0x243   : > { %759 = vst [vmem:[%s229_s26] sm:$0x1] %v758_v35 }
 0x244   : > { %1151 = shalt.err (!%p1148_p3)
}
 0x245   : > { %s1152_s30 = scalar_lea.hbm %s1488_s9, 16  ;;  %s1156_s16 = scalar_lea.hbm %s1535_s5, 48 }
 0x246   : > { %p1153_p4 = scmp.ne.s32.totalorder %s1488_s9, %s1152_s30  ;;  %p1157_p9 = scmp.lt.u32.totalorder %s1488_s9, %s1535_s5 }
 0x247   : > { %p1158_p10 = scmp.lt.u32.totalorder %s1156_s16, %s1152_s30  ;;  %p1160_p12 = scmp.lt.u32.totalorder %s1152_s30, %s1488_s9 }
 0x248   : > { %p1154_p7 = pnand %p1153_p4, %p1272_p5 }
 0x249   : > { %p1159_p11 = por %p1158_p10, %p1157_p9 }
 0x24a   : > { %p1155_p8 = pneg %p1154_p7 }
 0x24b   : > { %p1161_p13 = por %p1160_p12, %p1159_p11 }
 0x24d   : > { %p1162_p0 = pnand %p1161_p13, %p1155_p8 }
 0x24f   : > { %1165 = shalt.err (!%p1162_p0)
}
 0x250   : > { %1096 = dma.vmem_to_hbm [thread:$0]  (%p1272_p5), %s1490_s6, 16, %s1488_s9, %s761_s22  }
 0x251 PF: > { %p1102_p1 = scmp.ge.s32.totalorder %s1200_s21, 2  ;;  %s785_s25 = sand.u32 1, %s1188_s18  }
 0x252   : > { %s786_s26 = scalar_lea.sflag [#allocation3], %s785_s25 }
 0x253   : > { %p1099_p2 = pnand %p1102_p1, %p1276_p6 }
 0x255   : > { %1183 = dma.done.wait (!%p1099_p2), %s786_s26, 16  }
 0x256   : > { %1185 = vsyncadd (!%p1099_p2), %s786_s26, 4294967280  ;;  %p15_p3 = scmp.ge.s32.totalorder %s1259_s24, 5   ;;  %s1540_s18 = smov %s1192_s19 }
 0x257   : > { %s1541_s19 = smov %s1196_s20  ;;  %s1542_s20 = smov %s1270_s27 }
 0x258   : > { %s1543_s21 = smov %s1259_s24  ;;  %17 = sbr.rel (!%p15_p3) target bundleno = 3 (0x3), region = 75 }
 0x25f   :  { %790 = vsyncpa [#allocation3], 1 }
 0x260   :  { %792 = vsyncpa [#allocation3 + $0x1], 1 }

</bundles_post_ra>
